<compile_context>
chip_gen: v7x
topology: tpu7x:2x2x1
jax: 0.10.0
libtpu: 0.0.40
codegen_flags: <defaults>
</compile_context>

<pallas_src>
import functools

import jax
import jax.numpy as jnp
from jax import lax
from jax.experimental import pallas as pl
from jax.experimental.pallas import tpu as pltpu


def _round_up(n, m):
    return ((n + m - 1) // m) * m


def dqn_kernel(x_ref, w1_ref, b1_ref, w2_ref, b2_ref, w3_ref, b3_ref, o_ref,
               *, chunk, n_chunks):
    """Three MXU matmuls (bf16 in, f32 accumulate) + f32 bias add + f32 ReLU.

    Processes the (bm, obs) x tile in `n_chunks` sub-chunks of `chunk` rows so
    the live f32 activations stay well under the 64-vreg register file even
    when the grid-step batch tile is 256+ rows.
    """

    def body(c, carry):
        r0 = pl.multiple_of(c * chunk, chunk)
        # x arrives as f32; cast to bf16 in-kernel (saves a wrapper-side XLA
        # cast + HBM round trip; obs is tiny so the DMA delta is irrelevant).
        x = x_ref[pl.ds(r0, chunk), :].astype(jnp.bfloat16)
        # NOTE: with obs=4 this first matmul uses only 4 MXU rows; it could be
        # done as 4 broadcasted VPU FMAs, but the absolute win is tiny.
        h1 = jnp.dot(x, w1_ref[...],
                     preferred_element_type=jnp.float32) + b1_ref[...]
        h1 = jnp.maximum(h1, 0.0)                       # f32 (safe on v5e)
        h2 = jnp.dot(h1.astype(jnp.bfloat16), w2_ref[...],
                     preferred_element_type=jnp.float32) + b2_ref[...]
        h2 = jnp.maximum(h2, 0.0)
        o_ref[pl.ds(r0, chunk), :] = (
            jnp.dot(h2.astype(jnp.bfloat16), w3_ref[...],
                    preferred_element_type=jnp.float32) + b3_ref[...])
        return carry

    lax.fori_loop(0, n_chunks, body, 0, unroll=True)


def prepare_dqn_params(params, *, lane=128):
    """One-time weight prep (run at init / target-network sync, NOT per call):
    cast weights to bf16, biases to f32, and zero-pad layer 3 to a lane-dense
    (128-wide) output slab so kernel stores are full `vst`."""
    w1, b1, w2, b2, w3, b3 = params
    actions = w3.shape[1]
    act_pad = _round_up(max(actions, lane), lane)
    w3p = jnp.zeros((w3.shape[0], act_pad), w3.dtype).at[:, :actions].set(w3)
    b3p = jnp.zeros((1, act_pad), b3.dtype).at[:, :actions].set(b3)
    return dict(
        w1=w1.astype(jnp.bfloat16), b1=b1.astype(jnp.float32),
        w2=w2.astype(jnp.bfloat16), b2=b2.astype(jnp.float32),
        w3=w3p.astype(jnp.bfloat16), b3=b3p.astype(jnp.float32),
        actions=actions, act_pad=act_pad)


def dqn_forward(x, prep, *, bm_cap=256):
    """x: (B, observations) float32. `prep` from prepare_dqn_params.
    Returns (B, actions) float32.

    bm_cap: max rows per grid step (cap keeps vreg/VMEM pressure sane; the
    in-kernel 128-row chunking handles anything up to the cap)."""
    w1, b1 = prep["w1"], prep["b1"]
    w2, b2 = prep["w2"], prep["b2"]
    w3, b3 = prep["w3"], prep["b3"]
    actions, act_pad = prep["actions"], prep["act_pad"]

    B, obs = x.shape
    hidden = w1.shape[1]

    CHUNK = 128  # in-kernel sub-chunk (rows live in vregs at once)

    if B <= CHUNK:
        bm_eff = max(16, _round_up(B, 16))   # one grid step, one sub-chunk
        chunk, n_chunks = bm_eff, 1
    else:
        bm_eff = min(_round_up(bm_cap, CHUNK), _round_up(B, CHUNK))
        chunk, n_chunks = CHUNK, bm_eff // CHUNK

    B_pad = _round_up(B, bm_eff)
    if B_pad != B:
        x = jnp.pad(x, ((0, B_pad - B), (0, 0)))

    grid = (B_pad // bm_eff,)

    # Weights/biases: constant block index (0, 0) -> resident in VMEM across
    # grid steps (no re-DMA per step).
    in_specs = [
        pl.BlockSpec((bm_eff, obs), lambda i: (i, 0)),       # x (f32)
        pl.BlockSpec((obs, hidden), lambda i: (0, 0)),       # w1 (bf16)
        pl.BlockSpec((1, hidden), lambda i: (0, 0)),         # b1 (f32)
        pl.BlockSpec((hidden, hidden), lambda i: (0, 0)),    # w2 (bf16)
        pl.BlockSpec((1, hidden), lambda i: (0, 0)),         # b2 (f32)
        pl.BlockSpec((hidden, act_pad), lambda i: (0, 0)),   # w3 padded (bf16)
        pl.BlockSpec((1, act_pad), lambda i: (0, 0)),        # b3 padded (f32)
    ]
    out_spec = pl.BlockSpec((bm_eff, act_pad), lambda i: (i, 0))

    kernel = functools.partial(dqn_kernel, chunk=chunk, n_chunks=n_chunks)

    out = pl.pallas_call(
        kernel,
        out_shape=jax.ShapeDtypeStruct((B_pad, act_pad), jnp.float32),
        grid_spec=pltpu.PrefetchScalarGridSpec(
            num_scalar_prefetch=0,
            grid=grid,
            in_specs=in_specs,
            out_specs=out_spec,
        ),
        compiler_params=pltpu.CompilerParams(
            dimension_semantics=("parallel",)),
    )(x, w1, b1, w2, b2, w3, b3)

    # Free layout plumbing: drop batch padding and lane padding.
    return out[:B, :actions]


def init_dqn_params(key, observations, actions, hidden=128):
    """Deterministic synthetic init matching nn.Linear shapes:
       layer1: (obs -> 128), layer2: (128 -> 128), layer3: (128 -> actions).
       PyTorch-style uniform(-1/sqrt(fan_in), 1/sqrt(fan_in))."""
    ks = jax.random.split(key, 6)

    def linear(kw, kb, fan_in, fan_out):
        bound = 1.0 / jnp.sqrt(jnp.float32(fan_in))
        w = jax.random.uniform(kw, (fan_in, fan_out), jnp.float32, -bound, bound)
        b = jax.random.uniform(kb, (1, fan_out), jnp.float32, -bound, bound)
        return w, b

    w1, b1 = linear(ks[0], ks[1], observations, hidden)
    w2, b2 = linear(ks[2], ks[3], hidden, hidden)
    w3, b3 = linear(ks[4], ks[5], hidden, actions)
    return (w1, b1, w2, b2, w3, b3)


def dqn_reference(x, params):
    """Pure-JAX reference mimicking the kernel's bf16-in / f32-accumulate math."""
    def bf(a):
        return a.astype(jnp.bfloat16).astype(jnp.float32)
    w1, b1, w2, b2, w3, b3 = params
    h1 = jnp.maximum(bf(x) @ bf(w1) + b1, 0.0)
    h2 = jnp.maximum(bf(h1) @ bf(w2) + b2, 0.0)
    return bf(h2) @ bf(w3) + b3


if __name__ == "__main__":
    key = jax.random.PRNGKey(0)
    k_x, k_p, k_x2 = jax.random.split(key, 3)

    # Small CartPole-like problem: 4 observations, 2 actions.
    OBS, ACT = 4, 2
    params = init_dqn_params(k_p, OBS, ACT)
    prep = prepare_dqn_params(params)        # hoisted out of the forward path

    # Case 1: tiny batch (8) -- exercises batch padding + lane-dense slicing,
    # single grid step, single in-kernel chunk.
    x_small = jax.random.normal(k_x, (8, OBS), jnp.float32)
    out_small = jax.block_until_ready(dqn_forward(x_small, prep))
    ref_small = dqn_reference(x_small, params)
    assert out_small.shape == (8, ACT)
    assert jnp.allclose(out_small, ref_small, atol=1e-3, rtol=1e-3), \
        "small-batch mismatch vs reference"

    # Case 2: realistic DQN replay batch (512) -- 2 grid steps of 256 rows
    # (both v7x TensorCores get work; only 1 extra step of overhead on
    # v5e/v6e), each step runs 2 unrolled 128-row chunks in-kernel.
    x_big = jax.random.normal(k_x2, (512, OBS), jnp.float32)
    out_big = jax.block_until_ready(dqn_forward(x_big, prep))
    ref_big = dqn_reference(x_big, params)
    assert out_big.shape == (512, ACT)
    assert jnp.allclose(out_big, ref_big, atol=1e-3, rtol=1e-3), \
        "big-batch mismatch vs reference"

    print("KERNEL_OK")
</pallas_src>

<mosaic_0001>
module attributes {stable_mosaic.version = 11 : i64} {
  func.func @dqn_kernel(%arg0: i32, %arg1: memref<16x4xf32, #tpu.memory_space<vmem>>, %arg2: memref<4x128xbf16, #tpu.memory_space<vmem>>, %arg3: memref<1x128xf32, #tpu.memory_space<vmem>>, %arg4: memref<128x128xbf16, #tpu.memory_space<vmem>>, %arg5: memref<1x128xf32, #tpu.memory_space<vmem>>, %arg6: memref<128x128xbf16, #tpu.memory_space<vmem>>, %arg7: memref<1x128xf32, #tpu.memory_space<vmem>>, %arg8: memref<16x128xf32, #tpu.memory_space<vmem>>) attributes {dimension_semantics = [#tpu.dimension_semantics<parallel>], iteration_bounds = array<i64: 1>, scalar_prefetch = 0 : i64, scratch_operands = 0 : i64, tpu.core_type = #tpu.core_type<tc>, window_params = [{transform_indices = @transform_0, window_bounds = array<i64: 16, 4>}, {pipeline_mode = #tpu.pipeline_mode<synchronous>, transform_indices = @transform_1, window_bounds = array<i64: 4, 128>}, {pipeline_mode = #tpu.pipeline_mode<synchronous>, transform_indices = @transform_2, window_bounds = array<i64: 1, 128>}, {pipeline_mode = #tpu.pipeline_mode<synchronous>, transform_indices = @transform_3, window_bounds = array<i64: 128, 128>}, {pipeline_mode = #tpu.pipeline_mode<synchronous>, transform_indices = @transform_4, window_bounds = array<i64: 1, 128>}, {pipeline_mode = #tpu.pipeline_mode<synchronous>, transform_indices = @transform_5, window_bounds = array<i64: 128, 128>}, {pipeline_mode = #tpu.pipeline_mode<synchronous>, transform_indices = @transform_6, window_bounds = array<i64: 1, 128>}, {transform_indices = @transform_7, window_bounds = array<i64: 16, 128>}]} {
    %c0_i32 = arith.constant 0 : i32
    %c16_i32 = arith.constant 16 : i32
    %0 = arith.muli %c0_i32, %c16_i32 : i32
    %1 = tpu.assume_multiple %0, 16 : i32
    %2 = arith.index_cast %1 : i32 to index
    %c0 = arith.constant 0 : index
    %3 = vector.load %arg1[%2, %c0] : memref<16x4xf32, #tpu.memory_space<vmem>>, vector<16x4xf32>
    %4 = arith.truncf %3 : vector<16x4xf32> to vector<16x4xbf16>
    %c0_0 = arith.constant 0 : index
    %c0_1 = arith.constant 0 : index
    %5 = vector.load %arg2[%c0_0, %c0_1] : memref<4x128xbf16, #tpu.memory_space<vmem>>, vector<4x128xbf16>
    %cst = arith.constant dense<0.000000e+00> : vector<16x128xf32>
    %6 = tpu.matmul %4, %5, %cst {dimension_numbers = #tpu.dot_dimension_numbers<[1], [0], [0], [1], [0, 0, 1, 1], [], []>} : vector<16x4xbf16>, vector<4x128xbf16>, vector<16x128xf32> -> vector<16x128xf32>
    %c0_2 = arith.constant 0 : index
    %c0_3 = arith.constant 0 : index
    %7 = vector.load %arg3[%c0_2, %c0_3] : memref<1x128xf32, #tpu.memory_space<vmem>>, vector<1x128xf32>
    %8 = vector.broadcast %7 : vector<1x128xf32> to vector<16x128xf32>
    %9 = arith.addf %6, %8 : vector<16x128xf32>
    %cst_4 = arith.constant 0.000000e+00 : f32
    %10 = vector.broadcast %cst_4 : f32 to vector<16x128xf32>
    %11 = arith.maximumf %9, %10 : vector<16x128xf32>
    %12 = arith.truncf %11 : vector<16x128xf32> to vector<16x128xbf16>
    %c0_5 = arith.constant 0 : index
    %c0_6 = arith.constant 0 : index
    %13 = vector.load %arg4[%c0_5, %c0_6] : memref<128x128xbf16, #tpu.memory_space<vmem>>, vector<128x128xbf16>
    %cst_7 = arith.constant dense<0.000000e+00> : vector<16x128xf32>
    %14 = tpu.matmul %12, %13, %cst_7 {dimension_numbers = #tpu.dot_dimension_numbers<[1], [0], [0], [1], [0, 0, 1, 1], [], []>} : vector<16x128xbf16>, vector<128x128xbf16>, vector<16x128xf32> -> vector<16x128xf32>
    %c0_8 = arith.constant 0 : index
    %c0_9 = arith.constant 0 : index
    %15 = vector.load %arg5[%c0_8, %c0_9] : memref<1x128xf32, #tpu.memory_space<vmem>>, vector<1x128xf32>
    %16 = vector.broadcast %15 : vector<1x128xf32> to vector<16x128xf32>
    %17 = arith.addf %14, %16 : vector<16x128xf32>
    %cst_10 = arith.constant 0.000000e+00 : f32
    %18 = vector.broadcast %cst_10 : f32 to vector<16x128xf32>
    %19 = arith.maximumf %17, %18 : vector<16x128xf32>
    %20 = arith.truncf %19 : vector<16x128xf32> to vector<16x128xbf16>
    %c0_11 = arith.constant 0 : index
    %c0_12 = arith.constant 0 : index
    %21 = vector.load %arg6[%c0_11, %c0_12] : memref<128x128xbf16, #tpu.memory_space<vmem>>, vector<128x128xbf16>
    %cst_13 = arith.constant dense<0.000000e+00> : vector<16x128xf32>
    %22 = tpu.matmul %20, %21, %cst_13 {dimension_numbers = #tpu.dot_dimension_numbers<[1], [0], [0], [1], [0, 0, 1, 1], [], []>} : vector<16x128xbf16>, vector<128x128xbf16>, vector<16x128xf32> -> vector<16x128xf32>
    %c0_14 = arith.constant 0 : index
    %c0_15 = arith.constant 0 : index
    %23 = vector.load %arg7[%c0_14, %c0_15] : memref<1x128xf32, #tpu.memory_space<vmem>>, vector<1x128xf32>
    %24 = vector.broadcast %23 : vector<1x128xf32> to vector<16x128xf32>
    %25 = arith.addf %22, %24 : vector<16x128xf32>
    %26 = arith.index_cast %1 : i32 to index
    %c0_16 = arith.constant 0 : index
    %27 = vector.load %arg8[%26, %c0_16] : memref<16x128xf32, #tpu.memory_space<vmem>>, vector<16x128xf32>
    tpu.vector_store %arg8[%26, %c0_16], %25 {strides = array<i32>} : memref<16x128xf32, #tpu.memory_space<vmem>>, vector<16x128xf32>,
    %c1_i32 = arith.constant 1 : i32
    return
  }
  func.func @transform_0(%arg0: i32) -> (i32, i32) {
    %c0_i32 = arith.constant 0 : i32
    %c0_i32_0 = arith.constant 0 : i32
    return %arg0, %c0_i32 : i32, i32
  }
  func.func @transform_1(%arg0: i32) -> (i32, i32) {
    %c0_i32 = arith.constant 0 : i32
    %c0_i32_0 = arith.constant 0 : i32
    %c0_i32_1 = arith.constant 0 : i32
    return %c0_i32, %c0_i32_0 : i32, i32
  }
  func.func @transform_2(%arg0: i32) -> (i32, i32) {
    %c0_i32 = arith.constant 0 : i32
    %c0_i32_0 = arith.constant 0 : i32
    %c0_i32_1 = arith.constant 0 : i32
    return %c0_i32, %c0_i32_0 : i32, i32
  }
  func.func @transform_3(%arg0: i32) -> (i32, i32) {
    %c0_i32 = arith.constant 0 : i32
    %c0_i32_0 = arith.constant 0 : i32
    %c0_i32_1 = arith.constant 0 : i32
    return %c0_i32, %c0_i32_0 : i32, i32
  }
  func.func @transform_4(%arg0: i32) -> (i32, i32) {
    %c0_i32 = arith.constant 0 : i32
    %c0_i32_0 = arith.constant 0 : i32
    %c0_i32_1 = arith.constant 0 : i32
    return %c0_i32, %c0_i32_0 : i32, i32
  }
  func.func @transform_5(%arg0: i32) -> (i32, i32) {
    %c0_i32 = arith.constant 0 : i32
    %c0_i32_0 = arith.constant 0 : i32
    %c0_i32_1 = arith.constant 0 : i32
    return %c0_i32, %c0_i32_0 : i32, i32
  }
  func.func @transform_6(%arg0: i32) -> (i32, i32) {
    %c0_i32 = arith.constant 0 : i32
    %c0_i32_0 = arith.constant 0 : i32
    %c0_i32_1 = arith.constant 0 : i32
    return %c0_i32, %c0_i32_0 : i32, i32
  }
  func.func @transform_7(%arg0: i32) -> (i32, i32) {
    %c0_i32 = arith.constant 0 : i32
    %c0_i32_0 = arith.constant 0 : i32
    return %arg0, %c0_i32 : i32, i32
  }
}

</mosaic_0001>

<bundles_post_ra>
// kernel: tpu_custom_call.1
= control target key start
LH: loop header
LB: loop body
LE: loop exit
PB: predicated region body
PF: predicated region fallthrough
CT: control target
= control target key end

     0   :  { %12 = vsyncpa [#allocation3], 0  ;;  %s675_s0 = inlined_call_operand.vmem [shape: f32[16,4], index: 0, kind: input, shape index: {}]   ;;  %s676_s1 = inlined_call_operand.vmem [shape: bf16[4,128], index: 1, kind: input, shape index: {}]   ;;  %s677_s2 = inlined_call_operand.vmem [shape: f32[1,128], index: 2, kind: input, shape index: {}]   ;;  %s678_s3 = inlined_call_operand.hbm [shape: bf16[128,128], index: 3, kind: input, shape index: {}]   ;;  %s679_s4 = inlined_call_operand.vmem [shape: f32[1,128], index: 4, kind: input, shape index: {}]   ;;  %s680_s5 = inlined_call_operand.hbm [shape: bf16[128,128], index: 5, kind: input, shape index: {}]   ;;  %s681_s6 = inlined_call_operand.vmem [shape: f32[1,128], index: 6, kind: input, shape index: {}]   ;;  %s682_s7 = inlined_call_operand.hbm [shape: f32[16,128], index: 7, kind: output, shape index: {}]  }
   0x1   :  { %13 = vsyncpa [#allocation6], 0 }
   0x2   :  { %14 = vsyncpa [#allocation4], 0  ;;  %s549_s24 = smov [#allocation2]   ;;  %s477_s28 = scalar_lea.hbm %s678_s3, 1024 }
   0x3   :  { %s26_s25 = sshll.u32 %s549_s24, 4  ;;  %p478_p0 = scmp.ne.s32.totalorder %s678_s3, %s477_s28  ;;  %s27_s25 = int_to_ptr.vmem [resolvable:$true] %s26_s25 }
   0x4   :  { %p481_p1 = scmp.lt.u32.totalorder %s477_s28, %s678_s3 }
   0x6   :  { %p483_p2 = pnand %p481_p1, %p478_p0 }
   0x8   :  { %486 = shalt.err (!%p483_p2)
}
   0x9   :  { %s487_s10 = scalar_lea.vmem %s27_s25, 1024  ;;  %p492_p4 = scmp.lt.s32.totalorder %s27_s25, %s27_s25 }
   0xa   :  { %p488_p3 = scmp.ne.s32.totalorder %s27_s25, %s487_s10  ;;  %p493_p5 = scmp.lt.s32.totalorder %s487_s10, %s487_s10 }
   0xc   :  { %p494_p6 = por %p493_p5, %p492_p4 }
   0xe   :  { %p495_p7 = pnand %p494_p6, %p488_p3 }
  0x10   :  { %498 = shalt.err (!%p495_p7)
}
  0x11   :  { %s550_s11 = smov 64   ;;  %s551_s12 = smov 4  }
  0x12   :  { %32 = dma.hbm_to_vmem [thread:$0]  %s678_s3, 1024, %s27_s25, [#allocation3], %s550_s11, %s550_s11, %s551_s12  }
  0x13   :  { %s552_s15 = smov [#allocation5]   ;;  %s499_s19 = scalar_lea.hbm %s680_s5, 1024 }
  0x14   :  { %s40_s16 = sshll.u32 %s552_s15, 4  ;;  %p500_p8 = scmp.ne.s32.totalorder %s680_s5, %s499_s19  ;;  %s41_s16 = int_to_ptr.vmem [resolvable:$true] %s40_s16 }
  0x15   :  { %p503_p9 = scmp.lt.u32.totalorder %s499_s19, %s680_s5 }
  0x17   :  { %p505_p10 = pnand %p503_p9, %p500_p8 }
  0x19   :  { %508 = shalt.err (!%p505_p10)
}
  0x1a   :  { %s509_s24 = scalar_lea.vmem %s41_s16, 1024  ;;  %p514_p12 = scmp.lt.s32.totalorder %s41_s16, %s41_s16 }
  0x1b   :  { %p510_p11 = scmp.ne.s32.totalorder %s41_s16, %s509_s24  ;;  %p515_p13 = scmp.lt.s32.totalorder %s509_s24, %s509_s24 }
  0x1d   :  { %p516_p0 = por %p515_p13, %p514_p12 }
  0x1f   :  { %p517_p1 = pnand %p516_p0, %p510_p11 }
  0x21   :  { %520 = shalt.err (!%p517_p1)
}
  0x22   :  { %46 = dma.hbm_to_vmem [thread:$0]  %s680_s5, 1024, %s41_s16, [#allocation6], %s550_s11, %s550_s11, %s551_s12  }
  0x23   :  { %543 = dma.done.wait [#allocation3], 1024  }
  0x24   :  { %544 = vsyncadd [#allocation3], 4294966272 }
  0x25   :  { %545 = dma.done.wait [#allocation6], 1024  }
  0x26   :  { %546 = vsyncadd [#allocation6], 4294966272  ;;  %v553_v0 = vmov 0.0   ;;  %vm554_vm0 = vmmov 0   ;;  %vm71_vm1 = vcmask 1041408   ;;  %v56_v2 = vld [vmem:[%s675_s0] sm:$0xff] }
  0x27   :  { %406 = vmatprep.subr.bf16.mxu0 %v553_v0  ;;  %408 = vmatprep.mubr.msk.bf16.mxu0 %vm554_vm0, %v553_v0  ;;  %v59_v1 = vld [vmem:[%s676_s1] sm:$0x3]  ;;  %v57_v3 = vld [vmem:[%s675_s0 + $0x8] sm:$0xff]  ;;  %vm67_vm2 = vcmask 31744   ;;  %v463_v8 = vld [vmem:[#allocation2 + $0x10] sm:$0xff]   ;;  %s555_s11 = smov [#allocation7]  }
  0x28   :  { %412 = vmatprep.subr.bf16.mxu1 %v553_v0  ;;  %428 = vmatprep.mubr.msk.bf16.mxu1 %vm554_vm0, %v553_v0  ;;  %v73_v4 = vsel %vm71_vm1, %v59_v1, 0  ;;  %v58_v5 = vpack.c.bf16 %v57_v3, %v56_v2  ;;  %v461_v6 = vld [vmem:[#allocation2] sm:$0xff]   ;;  %v462_v7 = vld [vmem:[#allocation2 + $0x8] sm:$0xff]   ;;  %v464_v9 = vld [vmem:[#allocation2 + $0x18] sm:$0xff]   ;;  %s353_s12 = sshll.u32 %s555_s11, 4  ;;  %s354_s12 = int_to_ptr.vmem [resolvable:$true] %s353_s12 }
  0x29   :  { %407 = vmatpush3.bf16.msra.mxu0 %v73_v4  ;;  %413 = vmatpush3.bf16.msra.mxu1 %v461_v6  ;;  %v465_v10 = vld [vmem:[#allocation2 + $0x20] sm:$0xff]   ;;  %v466_v11 = vld [vmem:[#allocation2 + $0x28] sm:$0xff]   ;;  %v467_v12 = vld [vmem:[#allocation2 + $0x30] sm:$0xff]   ;;  %p526_p3 = scmp.lt.s32.totalorder %s354_s12, %s354_s12 }
  0x2a   :  { %432 = vmatprep.subr.bf16.mxu0 %v553_v0  ;;  %414 = vmatprep.subr.bf16.mxu1 %v553_v0  ;;  %v468_v13 = vld [vmem:[#allocation2 + $0x38] sm:$0xff]   ;;  %v469_v14 = vld [vmem:[#allocation5] sm:$0xff]   ;;  %v470_v15 = vld [vmem:[#allocation5 + $0x8] sm:$0xff]  }
  0x2b   :  { %v471_v16 = vld [vmem:[#allocation5 + $0x10] sm:$0xff]   ;;  %v472_v17 = vld [vmem:[#allocation5 + $0x18] sm:$0xff]   ;;  %v473_v18 = vld [vmem:[#allocation5 + $0x20] sm:$0xff]  }
  0x2c   :  { %409 = vmatmul.mubr.msk.bf16.vlgmr.msra.gmra.mrb[0].mxu0 %vm67_vm2, %v58_v5  ;;  %v474_v19 = vld [vmem:[#allocation5 + $0x28] sm:$0xff]   ;;  %v366_v20 = vld [vmem:[%s677_s2] ss:$0 sm:$0xff]  ;;  %v475_v30 = vld [vmem:[#allocation5 + $0x30] sm:$0xff]  }
  0x2d   :  { %448 = vmatprep.mubr.msk.bf16.mxu0 %vm554_vm0, %v553_v0  ;;  %415 = vmatpush3.bf16.msra.mxu1 %v462_v7  ;;  %v476_v31 = vld [vmem:[#allocation5 + $0x38] sm:$0xff]   ;;  %v368_v32 = vld [vmem:[%s679_s4] ss:$0 sm:$0xff]  ;;  %s521_s4 = scalar_lea.vmem %s354_s12, 256 }
  0x2e   :  { %416 = vmatprep.subr.bf16.mxu1 %v553_v0  ;;  %433 = vmatpush3.bf16.msra.mxu0 %v469_v14  ;;  %v377_v42 = vld [vmem:[%s681_s6] ss:$0 sm:$0xff]  ;;  %p522_p2 = scmp.ne.s32.totalorder %s354_s12, %s521_s4  ;;  %p527_p4 = scmp.lt.s32.totalorder %s521_s4, %s521_s4 }
  0x2f   :  { %434 = vmatprep.subr.bf16.mxu0 %v553_v0 }
  0x30   :  { %p528_p5 = por %p527_p4, %p526_p3 }
  0x31   :  { %417 = vmatpush3.bf16.msra.mxu1 %v463_v8 }
  0x32   :  { %418 = vmatprep.subr.bf16.mxu1 %v553_v0  ;;  %435 = vmatpush3.bf16.msra.mxu0 %v470_v15  ;;  %p529_p6 = pnand %p528_p5, %p522_p2 }
  0x33   :  { %436 = vmatprep.subr.bf16.mxu0 %v553_v0 }
  0x35   :  { %419 = vmatpush3.bf16.msra.mxu1 %v464_v9 }
  0x36   :  { %420 = vmatprep.subr.bf16.mxu1 %v553_v0  ;;  %437 = vmatpush3.bf16.msra.mxu0 %v471_v16 }
  0x37   :  { %438 = vmatprep.subr.bf16.mxu0 %v553_v0 }
  0x39   :  { %421 = vmatpush3.bf16.msra.mxu1 %v465_v10 }
  0x3a   :  { %422 = vmatprep.subr.bf16.mxu1 %v553_v0  ;;  %439 = vmatpush3.bf16.msra.mxu0 %v472_v17 }
  0x3b   :  { %440 = vmatprep.subr.bf16.mxu0 %v553_v0 }
  0x3d   :  { %423 = vmatpush3.bf16.msra.mxu1 %v466_v11 }
  0x3e   :  { %424 = vmatprep.subr.bf16.mxu1 %v553_v0  ;;  %441 = vmatpush3.bf16.msra.mxu0 %v473_v18 }
  0x3f   :  { %442 = vmatprep.subr.bf16.mxu0 %v553_v0 }
  0x41   :  { %425 = vmatpush3.bf16.msra.mxu1 %v467_v12 }
  0x42   :  { %426 = vmatprep.subr.bf16.mxu1 %v553_v0  ;;  %443 = vmatpush3.bf16.msra.mxu0 %v474_v19 }
  0x43   :  { %444 = vmatprep.subr.bf16.mxu0 %v553_v0 }
  0x45   :  { %427 = vmatpush3.bf16.msra.mxu1 %v468_v13 }
  0x46   :  { %445 = vmatpush3.bf16.msra.mxu0 %v475_v30 }
  0x47   :  { %446 = vmatprep.subr.bf16.mxu0 %v553_v0 }
  0x4a   :  { %447 = vmatpush3.bf16.msra.mxu0 %v476_v31 }
  0xff   :  { %v109_v21 = vpop.f32.mrb[0].mxu0 }
 0x100   :  { %v110_v22 = vadd.f32 %v366_v20, %v109_v21  ;;  %v410_v23 = vpop.f32.mrb[1].mxu0 }
 0x101   :  { %v112_v24 = vpop.f32.mrb[2].mxu0 }
 0x102   :  { %v113_v25 = vadd.f32 %v366_v20, %v112_v24  ;;  %v411_v26 = vpop.f32.mrb[3].mxu0  ;;  %v116_v27 = vmax.f32 %v110_v22, 0.0 }
 0x104   :  { %v117_v28 = vmax.f32 %v113_v25, 0.0 }
 0x106   :  { %v118_v29 = vpack.c.bf16 %v117_v28, %v116_v27 }
 0x108   :  { %429 = vmatmul.mubr.bf16.vlgmr.msra.gmra.mrb[0].mxu1 %v118_v29 }
 0x1db   :  { %v224_v33 = vpop.f32.mrb[0].mxu1 }
 0x1dc   :  { %v225_v34 = vadd.f32 %v368_v32, %v224_v33  ;;  %v430_v35 = vpop.f32.mrb[1].mxu1 }
 0x1dd   :  { %v227_v36 = vpop.f32.mrb[2].mxu1 }
 0x1de   :  { %v228_v37 = vadd.f32 %v368_v32, %v227_v36  ;;  %v431_v38 = vpop.f32.mrb[3].mxu1  ;;  %v231_v39 = vmax.f32 %v225_v34, 0.0 }
 0x1e0   :  { %v232_v40 = vmax.f32 %v228_v37, 0.0 }
 0x1e2   :  { %v233_v41 = vpack.c.bf16 %v232_v40, %v231_v39 }
 0x1e4   :  { %449 = vmatmul.mubr.bf16.vlgmr.msra.gmra.mrb[4].mxu0 %v233_v41 }
 0x2b7   :  { %v339_v43 = vpop.f32.mrb[4].mxu0 }
 0x2b8   :  { %v340_v44 = vadd.f32 %v377_v42, %v339_v43  ;;  %v450_v45 = vpop.f32.mrb[5].mxu0 }
 0x2b9   :  { %v342_v46 = vpop.f32.mrb[6].mxu0 }
 0x2ba   :  { %346 = vst [vmem:[#allocation7] sm:$0xff] %v340_v44  ;;  %v343_v47 = vadd.f32 %v377_v42, %v342_v46  ;;  %v451_v48 = vpop.f32.mrb[7].mxu0 }
 0x2bc   :  { %347 = vst [vmem:[#allocation7 + $0x8] sm:$0xff] %v343_v47 }
 0x2bd   :  { %532 = shalt.err (!%p529_p6)
}
 0x2be   :  { %s533_s14 = scalar_lea.hbm %s682_s7, 256 }
 0x2bf   :  { %p534_p7 = scmp.ne.s32.totalorder %s682_s7, %s533_s14  ;;  %p537_p8 = scmp.lt.u32.totalorder %s533_s14, %s682_s7 }
 0x2c1   :  { %p539_p9 = pnand %p537_p8, %p534_p7 }
 0x2c3   :  { %542 = shalt.err (!%p539_p9)
}
 0x2c4   :  { %s556_s19 = smov 128   ;;  %s557_s20 = smov 8  }
 0x2c5   :  { %359 = dma.vmem_to_hbm [thread:$0]  %s354_s12, 256, %s682_s7, [#allocation4], %s556_s19, %s556_s19, %s557_s20  }
 0x2c6   :  { %547 = dma.done.wait [#allocation4], 256  }
 0x2c7   :  { %548 = vsyncadd [#allocation4], 4294967040 }
 0x2c8   :  { %363 = vsyncpa [#allocation3], 1 }
 0x2c9   :  { %364 = vsyncpa [#allocation6], 1 }
 0x2ca   :  { %365 = vsyncpa [#allocation4], 1 }

</bundles_post_ra>
